<compile_context>
chip_gen: v7x
topology: tpu7x:2x2x1
jax: 0.10.0
libtpu: 0.0.40
codegen_flags: <defaults>
</compile_context>

<pallas_src>
import numpy as np
import jax
import jax.numpy as jnp
from jax.experimental import pallas as pl

# ---------------- config (small, consistent with the module) ----------------
B = 2                   # batch
S = 16                  # input_size
CH = (4, 8)             # channels
KS = ((3, 3), (5, 5))   # kernelsizes
L = len(KS)
S2, S4 = S // 2, S // 4
HID = 32                # Alin1 hidden
FH = 10                 # final_layer hidden

C0, C1 = CH
N1P = C0 * S2           # 32  pooled conv1 features per branch (channel-major)
N2P = C1 * S4           # 32  pooled conv2 features per branch (== Flatten width)
LAN1P = L * N1P         # 64
LAN2P = L * N2P         # 64
LHID = L * HID          # 64
WCOLS = 128

# packed-slab row offsets (blocks start on 16-row boundaries for bf16 tiling)
R_T1 = 0                # conv1' (pool folded)            : 16 rows
R_T2 = R_T1 + S         # 16   conv2' (pool folded)       : 64 rows
R_W1 = R_T2 + LAN1P     # 80   Alin1 block-diagonal       : 64 rows
R_W2 = R_W1 + LAN2P     # 144  Alin2 block-diagonal       : 64 rows
R_B = R_W2 + LHID       # 208  4 bias rows
R_F = 224               # final mixing MLP block          : 16 rows
R_END = 240


# ---------------- glue: lower conv (replicate pad) to a dense matrix --------
def conv_as_matrix(w, length, pad):
    """Conv1d (cross-correlation, stride 1, replicate padding) as a dense
    matmul on channel-major flattened activations.
    w: (Cout, Cin, K)  ->  T: (Cin*length, Cout*length)."""
    Cout, Cin, K = w.shape
    T = np.zeros((Cin * length, Cout * length), np.float32)
    for co in range(Cout):
        for ci in range(Cin):
            for t in range(length):
                for j in range(K):
                    s = min(max(t - pad + j, 0), length - 1)   # replicate pad
                    T[ci * length + s, co * length + t] += w[co, ci, j]
    return T


# ---------------- deterministic parameter init (shapes from __init__) -------
def init_params(key):
    params = []
    for (k0, k1) in KS:
        key, *ks = jax.random.split(key, 9)
        params.append(dict(
            w1=0.3 * jax.random.normal(ks[0], (CH[0], 1, k0), jnp.float32),
            b1=0.1 * jax.random.normal(ks[1], (CH[0],), jnp.float32),
            w2=0.3 * jax.random.normal(ks[2], (CH[1], CH[0], k1), jnp.float32),
            b2=0.1 * jax.random.normal(ks[3], (CH[1],), jnp.float32),
            wl1=0.3 * jax.random.normal(ks[4], (HID, CH[1] * S4), jnp.float32),
            bl1=0.1 * jax.random.normal(ks[5], (HID,), jnp.float32),
            wl2=0.3 * jax.random.normal(ks[6], (1, HID), jnp.float32),
            bl2=0.1 * jax.random.normal(ks[7], (1,), jnp.float32),
        ))
    key, ka, kb, kc, kd = jax.random.split(key, 5)
    fin = dict(
        wf1=0.3 * jax.random.normal(ka, (FH, L), jnp.float32),
        bf1=0.1 * jax.random.normal(kb, (FH,), jnp.float32),
        wf2=0.3 * jax.random.normal(kc, (1, FH), jnp.float32),
        bf2=0.1 * jax.random.normal(kd, (1,), jnp.float32),
    )
    return params, fin


# ---------------- pack everything into ONE bf16 slab ------------------------
def build_packed(params, fin):
    Wbig = np.zeros((R_END, WCOLS), np.float32)
    for l, (p, (k0, k1)) in enumerate(zip(params, KS)):
        pad1, pad2 = (k0 - 1) // 2, (k1 - 1) // 2

        # Aconv1 (+replicate pad) with Amaxp1 folded: even taps -> lanes
        # [l*N1P,(l+1)*N1P), odd taps -> 64 + same lane.
        T1 = conv_as_matrix(np.asarray(p['w1']), S, pad1)        # (S, C0*S)
        for c in range(C0):
            for t in range(S):
                u, par = divmod(t, 2)
                Wbig[R_T1:R_T2, par * LAN1P + l * N1P + c * S2 + u] = T1[:, c * S + t]
        Wbig[R_B, l * N1P:(l + 1) * N1P] = np.repeat(np.asarray(p['b1']), S2)

        # Aconv2 with Amaxp2 folded (block-diagonal across branches)
        T2 = conv_as_matrix(np.asarray(p['w2']), S2, pad2)       # (C0*S2, C1*S2)
        rows = slice(R_T2 + l * N1P, R_T2 + (l + 1) * N1P)
        for co in range(C1):
            for t in range(S2):
                u, par = divmod(t, 2)
                Wbig[rows, par * LAN2P + l * N2P + co * S4 + u] = T2[:, co * S2 + t]
        Wbig[R_B + 1, l * N2P:(l + 1) * N2P] = np.repeat(np.asarray(p['b2']), S4)

        # Alin1 / Alin2 (block-diagonal across branches)
        Wbig[R_W1 + l * N2P:R_W1 + (l + 1) * N2P, l * HID:(l + 1) * HID] = np.asarray(p['wl1']).T
        Wbig[R_B + 2, l * HID:(l + 1) * HID] = np.asarray(p['bl1'])
        Wbig[R_W2 + l * HID:R_W2 + (l + 1) * HID, l] = np.asarray(p['wl2'])[0]
        Wbig[R_B + 3, l] = np.asarray(p['bl2'])[0]

    # final mixing MLP: wf1 cols 0..L-1, bf1 col L, wf2^T col L+1, bf2 (R_F, L+2)
    Wbig[R_F:R_F + FH, 0:L] = np.asarray(fin['wf1'])
    Wbig[R_F:R_F + FH, L] = np.asarray(fin['bf1'])
    Wbig[R_F:R_F + FH, L + 1] = np.asarray(fin['wf2'])[0]
    Wbig[R_F, L + 2] = np.asarray(fin['bf2'])[0]
    return jnp.asarray(Wbig, jnp.bfloat16)


# ---------------- the single fused Pallas kernel -----------------------------
def fused_kernel(x_ref, w_ref, o_ref):
    f32 = jnp.float32
    bf16 = jnp.bfloat16

    def elu(z):
        # single transcendental; error near zero ~1 ulp of 1.0 (<< test tol)
        return jnp.where(z > 0, z, jnp.exp(jnp.minimum(z, 0.0)) - 1.0)

    x = x_ref[...].astype(bf16)                                      # (B, S)
    bias = w_ref[R_B:R_B + 4, :].astype(f32)                         # (4, 128)
    fin = w_ref[R_F:R_F + 16, :].astype(f32)                         # (16, 128)

    # conv1(+replicate pad)+maxpool folded: even/odd taps in lane halves.
    # max(tanh(a+b), tanh(c+b)) == tanh(max(a,c)+b)  (tanh monotone, shared bias).
    pre1 = jnp.dot(x, w_ref[R_T1:R_T2, :], preferred_element_type=f32)          # (B, 128)
    p1 = jnp.tanh(jnp.maximum(pre1[:, :LAN1P], pre1[:, LAN1P:]) + bias[0:1, :LAN1P])  # (B, 64)

    # conv2+maxpool folded (block-diagonal across branches)
    pre2 = jnp.dot(p1.astype(bf16), w_ref[R_T2:R_W1, :], preferred_element_type=f32)  # (B, 128)
    p2 = jnp.tanh(jnp.maximum(pre2[:, :LAN2P], pre2[:, LAN2P:]) + bias[1:2, :LAN2P])  # (B, 64)

    # Alin1 + ELU   (p2 lane order == torch Flatten channel-major order)
    z1 = jnp.dot(p2.astype(bf16), w_ref[R_W1:R_W2, :LHID],
                 preferred_element_type=f32) + bias[2:3, :LHID]                 # (B, 64)
    e1 = elu(z1)

    # Alin2 -> per-branch scalars: z2[b, l] = branch-l output on batch b
    z2 = jnp.dot(e1.astype(bf16), w_ref[R_W2:R_B, :L],
                 preferred_element_type=f32) + bias[3:4, :L]                    # (B, L)

    # Final mixing MLP on the VPU (no MXU tail), transposed orientation.
    # torch does mid.view(B,-1) on mid of shape (L,B,1); for L == B this is
    # exactly z2^T, so a[i,b] = sum_l wf1[i,l]*z2[l,b] + bf1[i].
    a = fin[0:FH, L:L + 1]                                           # bf1, (FH, 1)
    for l in range(L):                                               # static unroll
        a = a + fin[0:FH, l:l + 1] * z2[l:l + 1, :]                  # (FH, B)
    outT = jnp.sum(fin[0:FH, L + 1:L + 2] * elu(a), axis=0, keepdims=True) \
        + fin[0:1, L + 2:L + 3]                                      # (1, B)
    o_ref[...] = outT


def forward_pallas(x, w_packed):
    x2 = x.reshape(B, S)                                  # Cin == 1
    outT = pl.pallas_call(
        fused_kernel,
        out_shape=jax.ShapeDtypeStruct((1, B), jnp.float32),
    )(x2, w_packed)
    # (1, B) -> (B, 1): values already in torch's output order
    return outT.reshape(B, 1)


# ---------------- plain-JAX f32 reference (for verification) ----------------
def forward_ref(x, params, fin):
    mids = []
    for p, (k0, k1) in zip(params, KS):
        pad1, pad2 = (k0 - 1) // 2, (k1 - 1) // 2
        xp = jnp.pad(x, ((0, 0), (0, 0), (pad1, pad1)), mode='edge')
        y1 = p['b1'][None, :, None] + sum(
            p['w1'][None, :, 0, j, None] * xp[:, :, j:j + S] for j in range(k0))
        h1 = jnp.tanh(y1)                                   # dropout = identity
        p1 = h1.reshape(B, CH[0], S2, 2).max(-1)
        p1p = jnp.pad(p1, ((0, 0), (0, 0), (pad2, pad2)), mode='edge')
        y2 = p['b2'][None, :, None] + sum(
            jnp.einsum('oc,bcl->bol', p['w2'][:, :, j], p1p[:, :, j:j + S2])
            for j in range(k1))
        h2 = jnp.tanh(y2)
        p2 = h2.reshape(B, CH[1], S4, 2).max(-1)
        flat = p2.reshape(B, -1)
        z1 = jax.nn.elu(flat @ p['wl1'].T + p['bl1'])
        mids.append(z1 @ p['wl2'].T + p['bl2'])
    mid = jnp.stack(mids)                                   # (L, B, 1)
    z = mid.reshape(B, -1)                                  # torch .view(B, -1) semantics
    h = jax.nn.elu(z @ fin['wf1'].T + fin['bf1'])
    return h @ fin['wf2'].T + fin['bf2']


if __name__ == "__main__":
    # the fused final-layer formulation relies on torch's view(B, -1) quirk, valid when L == B
    assert L == B

    key = jax.random.PRNGKey(0)
    kx, kp = jax.random.split(key)
    x = jax.random.normal(kx, (B, 1, S), jnp.float32)       # NCL like PyTorch
    params, fin = init_params(kp)
    w_packed = build_packed(params, fin)

    fwd = jax.jit(forward_pallas)
    out = jax.block_until_ready(fwd(x, w_packed))

    ref = forward_ref(x, params, fin)
    assert out.shape == (B, 1)
    # bf16 weight slab + bf16 MXU operands (f32 accumulate) -> tolerance sized
    # to bf16 matmul precision vs the f32 reference.
    np.testing.assert_allclose(np.asarray(out), np.asarray(ref), rtol=2e-2, atol=2e-2)
    print("KERNEL_OK")
</pallas_src>

<mosaic_0001>
module attributes {stable_mosaic.version = 11 : i64} {
  func.func @fused_kernel(%arg0: memref<2x16xf32, #tpu.memory_space<vmem>>, %arg1: memref<240x128xbf16, #tpu.memory_space<vmem>>, %arg2: memref<1x2xf32, #tpu.memory_space<vmem>>) attributes {dimension_semantics = [], scalar_prefetch = 0 : i64, scratch_operands = 0 : i64, tpu.core_type = #tpu.core_type<tc>} {
    %c0 = arith.constant 0 : index
    %c0_0 = arith.constant 0 : index
    %0 = vector.load %arg0[%c0, %c0_0] : memref<2x16xf32, #tpu.memory_space<vmem>>, vector<2x16xf32>
    %1 = arith.truncf %0 : vector<2x16xf32> to vector<2x16xbf16>
    %c208 = arith.constant 208 : index
    %c0_1 = arith.constant 0 : index
    %2 = vector.load %arg1[%c208, %c0_1] : memref<240x128xbf16, #tpu.memory_space<vmem>>, vector<4x128xbf16>
    %3 = arith.extf %2 : vector<4x128xbf16> to vector<4x128xf32>
    %c224 = arith.constant 224 : index
    %c0_2 = arith.constant 0 : index
    %4 = vector.load %arg1[%c224, %c0_2] : memref<240x128xbf16, #tpu.memory_space<vmem>>, vector<16x128xbf16>
    %5 = arith.extf %4 : vector<16x128xbf16> to vector<16x128xf32>
    %c0_3 = arith.constant 0 : index
    %c0_4 = arith.constant 0 : index
    %6 = vector.load %arg1[%c0_3, %c0_4] : memref<240x128xbf16, #tpu.memory_space<vmem>>, vector<16x128xbf16>
    %cst = arith.constant dense<0.000000e+00> : vector<2x128xf32>
    %7 = tpu.matmul %1, %6, %cst {dimension_numbers = #tpu.dot_dimension_numbers<[1], [0], [0], [1], [0, 0, 1, 1], [], []>} : vector<2x16xbf16>, vector<16x128xbf16>, vector<2x128xf32> -> vector<2x128xf32>
    %8 = vector.extract_strided_slice %7 {offsets = [0, 0], sizes = [2, 64], strides = [1, 1]} : vector<2x128xf32> to vector<2x64xf32>
    %9 = vector.extract_strided_slice %7 {offsets = [0, 64], sizes = [2, 64], strides = [1, 1]} : vector<2x128xf32> to vector<2x64xf32>
    %10 = arith.maximumf %8, %9 : vector<2x64xf32>
    %11 = vector.extract_strided_slice %3 {offsets = [0, 0], sizes = [1, 64], strides = [1, 1]} : vector<4x128xf32> to vector<1x64xf32>
    %12 = vector.broadcast %11 : vector<1x64xf32> to vector<2x64xf32>
    %13 = arith.addf %10, %12 : vector<2x64xf32>
    %14 = math.tanh %13 : vector<2x64xf32>
    %15 = arith.truncf %14 : vector<2x64xf32> to vector<2x64xbf16>
    %c16 = arith.constant 16 : index
    %c0_5 = arith.constant 0 : index
    %16 = vector.load %arg1[%c16, %c0_5] : memref<240x128xbf16, #tpu.memory_space<vmem>>, vector<64x128xbf16>
    %cst_6 = arith.constant dense<0.000000e+00> : vector<2x128xf32>
    %17 = tpu.matmul %15, %16, %cst_6 {dimension_numbers = #tpu.dot_dimension_numbers<[1], [0], [0], [1], [0, 0, 1, 1], [], []>} : vector<2x64xbf16>, vector<64x128xbf16>, vector<2x128xf32> -> vector<2x128xf32>
    %18 = vector.extract_strided_slice %17 {offsets = [0, 0], sizes = [2, 64], strides = [1, 1]} : vector<2x128xf32> to vector<2x64xf32>
    %19 = vector.extract_strided_slice %17 {offsets = [0, 64], sizes = [2, 64], strides = [1, 1]} : vector<2x128xf32> to vector<2x64xf32>
    %20 = arith.maximumf %18, %19 : vector<2x64xf32>
    %21 = vector.extract_strided_slice %3 {offsets = [1, 0], sizes = [1, 64], strides = [1, 1]} : vector<4x128xf32> to vector<1x64xf32>
    %22 = vector.broadcast %21 : vector<1x64xf32> to vector<2x64xf32>
    %23 = arith.addf %20, %22 : vector<2x64xf32>
    %24 = math.tanh %23 : vector<2x64xf32>
    %25 = arith.truncf %24 : vector<2x64xf32> to vector<2x64xbf16>
    %c80 = arith.constant 80 : index
    %c0_7 = arith.constant 0 : index
    %26 = vector.load %arg1[%c80, %c0_7] : memref<240x128xbf16, #tpu.memory_space<vmem>>, vector<64x64xbf16>
    %cst_8 = arith.constant dense<0.000000e+00> : vector<2x64xf32>
    %27 = tpu.matmul %25, %26, %cst_8 {dimension_numbers = #tpu.dot_dimension_numbers<[1], [0], [0], [1], [0, 0, 1, 1], [], []>} : vector<2x64xbf16>, vector<64x64xbf16>, vector<2x64xf32> -> vector<2x64xf32>
    %28 = vector.extract_strided_slice %3 {offsets = [2, 0], sizes = [1, 64], strides = [1, 1]} : vector<4x128xf32> to vector<1x64xf32>
    %29 = vector.broadcast %28 : vector<1x64xf32> to vector<2x64xf32>
    %30 = arith.addf %27, %29 : vector<2x64xf32>
    %cst_9 = arith.constant 0.000000e+00 : f32
    %31 = vector.broadcast %cst_9 : f32 to vector<2x64xf32>
    %32 = arith.cmpf ogt, %30, %31 : vector<2x64xf32>
    %cst_10 = arith.constant 0.000000e+00 : f32
    %33 = vector.broadcast %cst_10 : f32 to vector<2x64xf32>
    %34 = arith.minimumf %30, %33 : vector<2x64xf32>
    %35 = math.exp %34 : vector<2x64xf32>
    %cst_11 = arith.constant 1.000000e+00 : f32
    %36 = vector.broadcast %cst_11 : f32 to vector<2x64xf32>
    %37 = arith.subf %35, %36 : vector<2x64xf32>
    %38 = arith.select %32, %30, %37 : vector<2x64xi1>, vector<2x64xf32>
    %39 = arith.truncf %38 : vector<2x64xf32> to vector<2x64xbf16>
    %c144 = arith.constant 144 : index
    %c0_12 = arith.constant 0 : index
    %40 = vector.load %arg1[%c144, %c0_12] : memref<240x128xbf16, #tpu.memory_space<vmem>>, vector<64x2xbf16>
    %cst_13 = arith.constant dense<0.000000e+00> : vector<2x2xf32>
    %41 = tpu.matmul %39, %40, %cst_13 {dimension_numbers = #tpu.dot_dimension_numbers<[1], [0], [0], [1], [0, 0, 1, 1], [], []>} : vector<2x64xbf16>, vector<64x2xbf16>, vector<2x2xf32> -> vector<2x2xf32>
    %42 = vector.extract_strided_slice %3 {offsets = [3, 0], sizes = [1, 2], strides = [1, 1]} : vector<4x128xf32> to vector<1x2xf32>
    %43 = vector.broadcast %42 : vector<1x2xf32> to vector<2x2xf32>
    %44 = arith.addf %41, %43 : vector<2x2xf32>
    %45 = vector.extract_strided_slice %5 {offsets = [0, 2], sizes = [10, 1], strides = [1, 1]} : vector<16x128xf32> to vector<10x1xf32>
    %46 = vector.extract_strided_slice %5 {offsets = [0, 0], sizes = [10, 1], strides = [1, 1]} : vector<16x128xf32> to vector<10x1xf32>
    %47 = vector.extract_strided_slice %44 {offsets = [0, 0], sizes = [1, 2], strides = [1, 1]} : vector<2x2xf32> to vector<1x2xf32>
    %48 = vector.broadcast %46 : vector<10x1xf32> to vector<10x2xf32>
    %49 = vector.broadcast %47 : vector<1x2xf32> to vector<10x2xf32>
    %50 = arith.mulf %48, %49 : vector<10x2xf32>
    %51 = vector.broadcast %45 : vector<10x1xf32> to vector<10x2xf32>
    %52 = arith.addf %51, %50 : vector<10x2xf32>
    %53 = vector.extract_strided_slice %5 {offsets = [0, 1], sizes = [10, 1], strides = [1, 1]} : vector<16x128xf32> to vector<10x1xf32>
    %54 = vector.extract_strided_slice %44 {offsets = [1, 0], sizes = [1, 2], strides = [1, 1]} : vector<2x2xf32> to vector<1x2xf32>
    %55 = vector.broadcast %53 : vector<10x1xf32> to vector<10x2xf32>
    %56 = vector.broadcast %54 : vector<1x2xf32> to vector<10x2xf32>
    %57 = arith.mulf %55, %56 : vector<10x2xf32>
    %58 = arith.addf %52, %57 : vector<10x2xf32>
    %59 = vector.extract_strided_slice %5 {offsets = [0, 3], sizes = [10, 1], strides = [1, 1]} : vector<16x128xf32> to vector<10x1xf32>
    %cst_14 = arith.constant 0.000000e+00 : f32
    %60 = vector.broadcast %cst_14 : f32 to vector<10x2xf32>
    %61 = arith.cmpf ogt, %58, %60 : vector<10x2xf32>
    %cst_15 = arith.constant 0.000000e+00 : f32
    %62 = vector.broadcast %cst_15 : f32 to vector<10x2xf32>
    %63 = arith.minimumf %58, %62 : vector<10x2xf32>
    %64 = math.exp %63 : vector<10x2xf32>
    %cst_16 = arith.constant 1.000000e+00 : f32
    %65 = vector.broadcast %cst_16 : f32 to vector<10x2xf32>
    %66 = arith.subf %64, %65 : vector<10x2xf32>
    %67 = arith.select %61, %58, %66 : vector<10x2xi1>, vector<10x2xf32>
    %68 = vector.broadcast %59 : vector<10x1xf32> to vector<10x2xf32>
    %69 = arith.mulf %68, %67 : vector<10x2xf32>
    %cst_17 = arith.constant dense<0.000000e+00> : vector<2xf32>
    %70 = vector.multi_reduction <add>, %69, %cst_17 [0] : vector<10x2xf32> to vector<2xf32>
    %71 = vector.shape_cast %70 : vector<2xf32> to vector<1x2xf32>
    %72 = vector.extract_strided_slice %5 {offsets = [0, 4], sizes = [1, 1], strides = [1, 1]} : vector<16x128xf32> to vector<1x1xf32>
    %73 = vector.broadcast %72 : vector<1x1xf32> to vector<1x2xf32>
    %74 = arith.addf %71, %73 : vector<1x2xf32>
    %c0_18 = arith.constant 0 : index
    %c0_19 = arith.constant 0 : index
    %75 = vector.load %arg2[%c0_18, %c0_19] : memref<1x2xf32, #tpu.memory_space<vmem>>, vector<1x2xf32>
    tpu.vector_store %arg2[%c0_18, %c0_19], %74 {strides = array<i32>} : memref<1x2xf32, #tpu.memory_space<vmem>>, vector<1x2xf32>,
    return
  }
}

</mosaic_0001>

<bundles_post_ra>
// kernel: forward_pallas.1
= control target key start
LH: loop header
LB: loop body
LE: loop exit
PB: predicated region body
PF: predicated region fallthrough
CT: control target
= control target key end

     0   :  { %7 = vsyncpa [#allocation3], 0  ;;  %s744_s0 = inlined_call_operand.vmem [shape: f32[2,16], index: 0, kind: input, shape index: {}]   ;;  %s745_s1 = inlined_call_operand.hbm [shape: bf16[240,128], index: 1, kind: input, shape index: {}]   ;;  %s746_s2 = inlined_call_operand.hbm [shape: f32[1,2], index: 2, kind: output, shape index: {}]  }
   0x1   :  { %8 = vsyncpa [#allocation4], 0  ;;  %s643_s9 = smov [#allocation2]   ;;  %s595_s13 = scalar_lea.hbm %s745_s1, 1920 }
   0x2   :  { %s16_s10 = sshll.u32 %s643_s9, 4  ;;  %p596_p0 = scmp.ne.s32.totalorder %s745_s1, %s595_s13  ;;  %s17_s10 = int_to_ptr.vmem [resolvable:$true] %s16_s10 }
   0x3   :  { %p599_p1 = scmp.lt.u32.totalorder %s595_s13, %s745_s1 }
   0x5   :  { %p601_p2 = pnand %p599_p1, %p596_p0 }
   0x7   :  { %604 = shalt.err (!%p601_p2)
}
   0x8   :  { %s605_s18 = scalar_lea.vmem %s17_s10, 1920  ;;  %p610_p4 = scmp.lt.s32.totalorder %s17_s10, %s17_s10 }
   0x9   :  { %p606_p3 = scmp.ne.s32.totalorder %s17_s10, %s605_s18  ;;  %p611_p5 = scmp.lt.s32.totalorder %s605_s18, %s605_s18 }
   0xb   :  { %p612_p6 = por %p611_p5, %p610_p4 }
   0xd   :  { %p613_p7 = pnand %p612_p6, %p606_p3 }
   0xf   :  { %616 = shalt.err (!%p613_p7)
}
  0x10   :  { %s644_s19 = smov 64   ;;  %s645_s20 = smov 4  }
  0x11   :  { %22 = dma.hbm_to_vmem [thread:$0]  %s745_s1, 1920, %s17_s10, [#allocation3], %s644_s19, %s644_s19, %s645_s20  }
  0x12   :  { %639 = dma.done.wait [#allocation3], 1920  }
  0x13   :  { %640 = vsyncadd [#allocation3], 4294965376  ;;  %v646_v0 = vmov 0.0   ;;  %vm647_vm0 = vmmov 0   ;;  %v570_v1 = vld [vmem:[#allocation2] sm:$0xff]   ;;  %vm43_vm1 = vcmask 130048   ;;  %v92_v12 = vlaneseq }
  0x14   :  { %491 = vmatprep.subr.bf16.mxu0 %v646_v0  ;;  %493 = vmatprep.mubr.msk.bf16.mxu0 %vm647_vm0, %v646_v0  ;;  %v27_v2 = vld [vmem:[%s744_s0] sm:$0x3]  ;;  %v571_v4 = vld [vmem:[#allocation2 + $0x8] sm:$0xff]   ;;  %v572_v5 = vld [vmem:[#allocation2 + $0x10] sm:$0xff]   ;;  %vm131_vm2 = vcmask 523264   ;;  %v648_v43 = vmov 0  }
  0x15   :  { %497 = vmatprep.subr.bf16.mxu1 %v646_v0  ;;  %505 = vmatprep.mubr.msk.bf16.mxu1 %vm647_vm0, %v646_v0  ;;  %v28_v3 = vpack.c.bf16 %v27_v2, %v27_v2  ;;  %v573_v6 = vld [vmem:[#allocation2 + $0x18] sm:$0xff]   ;;  %v574_v8 = vld [vmem:[#allocation2 + $0x20] sm:$0xff]   ;;  %v700_v13 = vshrl.u32 %v92_v12, 7  ;;  %v29_v14 = vld [vmem:[#allocation2 + $0x68] sm:$0x3]  ;;  %v649_v46 = vmov 1  }
  0x16   :  { %492 = vmatpush3.bf16.msra.mxu0 %v570_v1  ;;  %498 = vmatpush3.bf16.msra.mxu1 %v571_v4  ;;  %v702_v15 = vunpack.c.l.bf16 %v29_v14  ;;  %v575_v23 = vld [vmem:[#allocation2 + $0x28] sm:$0xff]   ;;  %v576_v24 = vld [vmem:[#allocation2 + $0x30] sm:$0xff]   ;;  %v577_v25 = vld [vmem:[#allocation2 + $0x38] sm:$0xff]   ;;  %v650_v48 = vmov 2   ;;  %v651_v49 = vmov 4   ;;  %v652_v50 = vmov 3  }
  0x17   :  { %509 = vmatprep.subr.bf16.mxu0 %v646_v0  ;;  %499 = vmatprep.subr.bf16.mxu1 %v646_v0  ;;  %v94_v16 = vsub.s32 0, %v700_v13  ;;  %v578_v27 = vld [vmem:[#allocation2 + $0x40] sm:$0xff]   ;;  %v182_v31 = vsub.s32 1, %v700_v13  ;;  %v579_v38 = vld [vmem:[#allocation2 + $0x48] sm:$0xff]   ;;  %v580_v39 = vld [vmem:[#allocation2 + $0x50] sm:$0xff]   ;;  %v197_v51 = vsub.s32 2, %v700_v13 }
  0x18   :  { %v581_v40 = vld [vmem:[#allocation2 + $0x58] sm:$0xff]   ;;  %v582_v41 = vld [vmem:[#allocation2 + $0x60] sm:$0xff]   ;;  %v473_v42 = vld [vmem:[#allocation2 + $0x70] sm:$0xff]   ;;  %544 = vset.pattern.permute.xlu1 %v648_v43  ;;  %556 = vset.pattern.permute.xlu0 %v649_v46  ;;  %vm416_vm5 = vcmask 15360   ;;  %vm418_vm7 = vcmask 9216   ;;  %s653_s0 = smov [#allocation5]  }
  0x19   :  { %494 = vmatmul.mubr.msk.bf16.vlgmr.msra.gmra.mrb[0].mxu0 %vm43_vm1, %v28_v3  ;;  %v95_v17 = vrot.slane %v702_v15, %v94_v16  ;;  %v183_v32 = vrot.slane %v702_v15, %v182_v31  ;;  %v471_v44 = vunpack.c.l.bf16 %v473_v42  ;;  %v472_v45 = vunpack.c.h.bf16 %v473_v42  ;;  %s440_s1 = sshll.u32 %s653_s0, 4  ;;  %s441_s1 = int_to_ptr.vmem [resolvable:$true] %s440_s1 }
  0x1a   :  { %517 = vmatprep.mubr.msk.bf16.mxu0 %vm647_vm0, %v646_v0  ;;  %500 = vmatpush3.bf16.msra.mxu1 %v572_v5  ;;  %v198_v52 = vrot.slane %v702_v15, %v197_v51  ;;  %vm432_vm8 = vcmask 8192   ;;  %s617_s25 = scalar_lea.vmem %s441_s1, 16  ;;  %s621_s26 = scalar_lea.vmem %s441_s1, 32 }
  0x1b   :  { %501 = vmatprep.subr.bf16.mxu1 %v646_v0  ;;  %510 = vmatpush3.bf16.msra.mxu0 %v575_v23  ;;  %v545_v47 = vpack.i.bf16 %v472_v45, %v471_v44  ;;  %p618_p8 = scmp.ne.s32.totalorder %s441_s1, %s617_s25  ;;  %p622_p9 = scmp.lt.s32.totalorder %s441_s1, %s441_s1 }
  0x1c   :  { %511 = vmatprep.subr.bf16.mxu0 %v646_v0  ;;  %p623_p10 = scmp.lt.s32.totalorder %s621_s26, %s617_s25 }
  0x1d   :  { %546 = vperm.xlu1 %544, %v545_v47  }
  0x1e   :  { %502 = vmatpush3.bf16.msra.mxu1 %v573_v6  ;;  %p624_p11 = por %p623_p10, %p622_p9 }
  0x1f   :  { %503 = vmatprep.subr.bf16.mxu1 %v646_v0  ;;  %512 = vmatpush3.bf16.msra.mxu0 %v576_v24 }
  0x20   :  { %513 = vmatprep.subr.bf16.mxu0 %v646_v0  ;;  %p625_p12 = pnand %p624_p11, %p618_p8 }
  0x21   :  { %550 = vset.pattern.permute.xlu1 %v650_v48 }
  0x22   :  { %504 = vmatpush3.bf16.msra.mxu1 %v574_v8  ;;  %552 = vperm.xlu1 %550, %v545_v47  }
  0x23   :  { %521 = vmatprep.subr.bf16.mxu1 %v646_v0  ;;  %514 = vmatpush3.bf16.msra.mxu0 %v577_v25 }
  0x24   :  { %515 = vmatprep.subr.bf16.mxu0 %v646_v0 }
  0x26   :  { %562 = vset.pattern.permute.xlu1 %v652_v50 }
  0x27   :  { %516 = vmatpush3.bf16.msra.mxu0 %v578_v27  ;;  %564 = vperm.xlu1 %562, %v545_v47  }
  0x2b   :  { %568 = vset.pattern.permute.xlu1 %v651_v49 }
  0x2c   :  { %428 = vperm.xlu1 %568, %v471_v44  }
  0x9c   :  { %v547_v1 = vpop.permute.xlu1 %546 }
  0x9d   :  { %v549_v8 = vunpack.i.h.bf16 %v547_v1 }
  0xa1   :  { %v553_v5 = vpop.permute.xlu1 %552 }
  0xec   :  { %v81_v7 = vpop.f32.mrb[0].mxu0 }
  0xed   :  { %88 = vrot.lane.b32.xlu0 %v81_v7, %s644_s19  ;;  %v495_v9 = vpop.f32.mrb[1].mxu0 }
  0xee   :  { %v84_v10 = vpop.f32.mrb[2].mxu0  ;;  %v548_v9 = vunpack.i.l.bf16 %v547_v1 }
  0xef   :  { %v496_v11 = vpop.f32.mrb[3].mxu0 }
 0x15f   :  { %v89_v18 = vpop.permute.xlu0 %88 }
 0x160   :  { %v91_v19 = vmax.f32 %v81_v7, %v89_v18 }
 0x162   :  { %v96_v20 = vadd.f32 %v95_v17, %v91_v19 }
 0x164   :  { %583 = vtanh.f32 %v96_v20 }
 0x16e   :  { %v584_v21 = vpop.eup %583 }
 0x16f   :  { %v98_v22 = vpack.c.bf16 %v584_v21, %v584_v21 }
 0x171   :  { %506 = vmatmul.mubr.msk.bf16.vlgmr.msra.gmra.mrb[0].mxu1 %vm131_vm2, %v98_v22 }
 0x172   :  { %529 = vmatprep.mubr.msk.bf16.mxu1 %vm647_vm0, %v646_v0  ;;  %522 = vmatpush3.bf16.msra.mxu1 %v579_v38 }
 0x173   :  { %523 = vmatprep.subr.bf16.mxu1 %v646_v0 }
 0x176   :  { %524 = vmatpush3.bf16.msra.mxu1 %v580_v39 }
 0x177   :  { %525 = vmatprep.subr.bf16.mxu1 %v646_v0 }
 0x17a   :  { %526 = vmatpush3.bf16.msra.mxu1 %v581_v40 }
 0x17b   :  { %527 = vmatprep.subr.bf16.mxu1 %v646_v0  ;;  %v283_v0 = vsub.s32 3, %v700_v13 }
 0x17d   :  { %v284_v2 = vrot.slane %v702_v15, %v283_v0 }
 0x17e   :  { %528 = vmatpush3.bf16.msra.mxu1 %v582_v41 }
 0x244   :  { %v169_v26 = vpop.f32.mrb[0].mxu1 }
 0x245   :  { %176 = vrot.lane.b32.xlu0 %v169_v26, %s644_s19  ;;  %v507_v28 = vpop.f32.mrb[1].mxu1 }
 0x246   :  { %v172_v29 = vpop.f32.mrb[2].mxu1 }
 0x247   :  { %v508_v30 = vpop.f32.mrb[3].mxu1 }
 0x248   :  { %v565_v30 = vpop.permute.xlu1 %564 }
 0x249   :  { %558 = vperm.xlu0 %556, %v545_v47  }
 0x24c   :  { %v429_v47 = vpop.permute.xlu1 %428 }
 0x24d   :  { %569 = vset.pattern.permute.xlu0 %v651_v49 }
 0x2b7   :  { %v177_v33 = vpop.permute.xlu0 %176 }
 0x2b8   :  { %v179_v34 = vmax.f32 %v169_v26, %v177_v33 }
 0x2ba   :  { %v184_v35 = vadd.f32 %v183_v32, %v179_v34  ;;  %v566_v32 = vunpack.i.l.bf16 %v565_v30 }
 0x2bc   :  { %585 = vtanh.f32 %v184_v35 }
 0x2c6   :  { %v586_v36 = vpop.eup %585 }
 0x2c7   :  { %v186_v37 = vpack.c.bf16 %v586_v36, %v586_v36 }
 0x2c8   :  { %v559_v3 = vpop.permute.xlu0 %558 }
 0x2c9   :  { %518 = vmatmul.mubr.msk.bf16.vlgmr.msra.gmra.mrb[4].mxu0 %vm131_vm2, %v186_v37  ;;  %v561_v10 = vunpack.i.h.bf16 %v559_v3  ;;  %v560_v11 = vunpack.i.l.bf16 %v559_v3 }
 0x39c   :  { %v260_v53 = vpop.f32.mrb[4].mxu0 }
 0x39d   :  { %v261_v54 = vadd.f32 %v260_v53, %v198_v52  ;;  %v519_v55 = vpop.f32.mrb[5].mxu0 }
 0x39e   :  { %v263_v56 = vpop.f32.mrb[6].mxu0 }
 0x39f   :  { %v267_v57 = vmin.f32 %v261_v54, 0.0  ;;  %v520_v58 = vpop.f32.mrb[7].mxu0  ;;  %vm266_vm3 = vcmp.gt.f32.partialorder %v261_v54, 0.0 }
 0x3a1   :  { %v268_v59 = vmul.f32 1.442695, %v267_v57 }
 0x3a3   :  { %587 = vpow2.f32 %v268_v59 }
 0x3ad   :  { %v588_v60 = vpop.eup %587 }
 0x3ae   :  { %v461_v61 = vadd.f32 -1.0, %v588_v60 }
 0x3b0   :  { %v271_v62 = vsel %vm266_vm3, %v261_v54, %v461_v61 }
 0x3b1   :  { %v272_v63 = vpack.c.bf16 %v271_v62, %v271_v62 }
 0x3b3   :  { %530 = vmatmul.mubr.msk.bf16.vlgmr.msra.gmra.mrb[4].mxu1 %vm131_vm2, %v272_v63 }
 0x486   :  { %v346_v4 = vpop.f32.mrb[4].mxu1 }
 0x487   :  { %v347_v6 = vadd.f32 %v346_v4, %v284_v2  ;;  %v531_v7 = vpop.f32.mrb[5].mxu1 }
 0x488   :  { %v349_v12 = vpop.f32.mrb[6].mxu1 }
 0x489   :  { %v365_v14 = vrot.slane %v347_v6, %v94_v16  ;;  %v389_v17 = vrot.slane %v347_v6, %v182_v31  ;;  %v532_v18 = vpop.f32.mrb[7].mxu1  ;;  %v567_v31 = vunpack.i.h.bf16 %v565_v30 }
 0x48b   :  { %v366_v19 = vmul.f32 %v548_v9, %v365_v14  ;;  %v367_v20 = vmul.f32 %v549_v8, %v365_v14  ;;  %v390_v15 = vmul.f32 %v560_v11, %v389_v17  ;;  %v391_v21 = vmul.f32 %v561_v10, %v389_v17 }
 0x48d   :  { %v593_v22 = vadd.low.f32.bf16 %v366_v19, %v553_v5  ;;  %v594_v23 = vadd.high.f32.bf16 %v367_v20, %v553_v5 }
 0x48f   :  { %v392_v24 = vadd.f32 %v593_v22, %v390_v15  ;;  %v393_v25 = vadd.f32 %v594_v23, %v391_v21 }
 0x491   :  { %v396_v26 = vmin.f32 %v392_v24, 0.0  ;;  %v397_v27 = vmin.f32 %v393_v25, 0.0  ;;  %vm394_vm4 = vcmp.gt.f32.partialorder %v392_v24, 0.0  ;;  %vm395_vm6 = vcmp.gt.f32.partialorder %v393_v25, 0.0 }
 0x493   :  { %v398_v28 = vmul.f32 1.442695, %v396_v26  ;;  %v400_v29 = vmul.f32 1.442695, %v397_v27 }
 0x495   :  { %589 = vpow2.f32 %v398_v28 }
 0x496   :  { %591 = vpow2.f32 %v400_v29 }
 0x49f   :  { %v590_v16 = vpop.eup %589 }
 0x4a0   :  { %v592_v13 = vpop.eup %591  ;;  %v467_v33 = vadd.f32 -1.0, %v590_v16 }
 0x4a1   :  { %v468_v34 = vadd.f32 -1.0, %v592_v13 }
 0x4a2   :  { %v404_v35 = vsel %vm394_vm4, %v392_v24, %v467_v33 }
 0x4a3   :  { %v405_v36 = vsel %vm395_vm6, %v393_v25, %v468_v34  ;;  %v414_v37 = vmul.f32 %v566_v32, %v404_v35 }
 0x4a4   :  { %v415_v38 = vmul.f32 %v567_v31, %v405_v36 }
 0x4a5   :  { %v417_v39 = vsel %vm416_vm5, %v414_v37, 0.0 }
 0x4a6   :  { %v419_v40 = vsel %vm418_vm7, %v415_v38, 0.0 }
 0x4a7   :  { %v420_v41 = vadd.f32 %v419_v40, %v417_v39 }
 0x4a9   :  { %v421_v42 = vrot.slane %v420_v41, 4 }
 0x4ab   :  { %v422_v43 = vadd.f32 %v421_v42, %v420_v41 }
 0x4ad   :  { %v423_v44 = vrot.slane %v422_v43, 2 }
 0x4af   :  { %v424_v45 = vadd.f32 %v423_v44, %v422_v43 }
 0x4b1   :  { %v425_v46 = vrot.slane %v424_v45, 1 }
 0x4b3   :  { %v426_v48 = vadd.f32 %v425_v46, %v424_v45 }
 0x4b5   :  { %v431_v49 = vadd.f32 %v429_v47, %v426_v48 }
 0x4b7   :  { %433 = vst.msk [vmem:[#allocation5] sm:$0x1] %vm432_vm8, %v431_v49 }
 0x4b8   :  { %628 = shalt.err (!%p625_p12)
}
 0x4b9   :  { %s629_s29 = scalar_lea.hbm %s746_s2, 16 }
 0x4ba   :  { %p630_p13 = scmp.ne.s32.totalorder %s746_s2, %s629_s29  ;;  %p633_p0 = scmp.lt.u32.totalorder %s629_s29, %s746_s2 }
 0x4bc   :  { %p635_p1 = pnand %p633_p0, %p630_p13 }
 0x4be   :  { %638 = shalt.err (!%p635_p1)
}
 0x4bf   :  { %443 = dma.vmem_to_hbm [thread:$0]  %s441_s1, 16, %s746_s2, [#allocation4]  }
 0x4c0   :  { %641 = dma.done.wait [#allocation4], 16  }
 0x4c1   :  { %642 = vsyncadd [#allocation4], 4294967280 }
 0x4c2   :  { %447 = vsyncpa [#allocation3], 1 }
 0x4c3   :  { %448 = vsyncpa [#allocation4], 1 }

</bundles_post_ra>
